<compile_context>
chip_gen: v6e
topology: v6e:2x2x1
jax: 0.10.0
libtpu: 0.0.40
codegen_flags: <defaults>
</compile_context>

<pallas_src>
import functools

import jax
import jax.numpy as jnp
import numpy as np
from jax.experimental import pallas as pl
from jax.experimental.pallas import tpu as pltpu


# ----------------------------------------------------------------------------
# Kernel 1: 3x3 max-pool peak suppression ("heatmap NMS")
# ----------------------------------------------------------------------------
def _peak_kernel(x_ref, o_ref, *, H):
    x = x_ref[...]                                   # (R, W), R = maps_per_step * H
    R, W = x.shape
    ninf = jnp.array(-jnp.inf, dtype=x.dtype)

    # separable 3x3 max: lane (W) pass ...
    col = jax.lax.broadcasted_iota(jnp.int32, (R, W), 1)
    left = jnp.where(col == 0, ninf, pltpu.roll(x, shift=1, axis=1))
    right = jnp.where(col == W - 1, ninf, pltpu.roll(x, shift=W - 1, axis=1))
    rmax = jnp.maximum(x, jnp.maximum(left, right))

    # ... then sublane (H) pass; the row-in-map mask also isolates stacked maps
    # (including whole garbage maps of a ragged tail block).
    row = jax.lax.broadcasted_iota(jnp.int32, (R, W), 0) % H
    up = jnp.where(row == 0, ninf, pltpu.roll(rmax, shift=1, axis=0))
    down = jnp.where(row == H - 1, ninf, pltpu.roll(rmax, shift=R - 1, axis=0))
    pooled = jnp.maximum(rmax, jnp.maximum(up, down))

    o_ref[...] = jnp.where(pooled == x, x, jnp.zeros_like(x))


def _pick_maps_per_step(n_maps, H, W, itemsize, budget=2 * 1024 * 1024):
    """Maps per block.  Prefers: fits the VMEM budget, 8-aligned sublane count,
    divides n_maps (no ragged tail), bigger blocks.  Never silently falls back
    to an oversized full-array block unless nothing aligned fits."""
    blk = lambda cb: cb * H * W * itemsize
    aligned = [cb for cb in range(1, n_maps + 1)
               if (cb * H) % 8 == 0 or cb == n_maps]
    fitting = [cb for cb in aligned if blk(cb) <= budget]
    if fitting:
        div_fit = [cb for cb in fitting if n_maps % cb == 0]
        return max(div_fit) if div_fit else max(fitting)
    # Nothing aligned fits (odd H with tiny n_maps): the whole array as one
    # block is the only legal layout left; n_maps is small so the block is too.
    return n_maps


def heatmap_peak_nms(heatmap):
    B, C, H, W = heatmap.shape
    BC = B * C
    x = heatmap.reshape(BC * H, W)                   # pure reshape, zero HBM cost
    cb = _pick_maps_per_step(BC, H, W, heatmap.dtype.itemsize)
    R = cb * H
    n_blocks = pl.cdiv(BC, cb)                       # ragged tail is safe (see kernel)
    out = pl.pallas_call(
        functools.partial(_peak_kernel, H=H),
        out_shape=jax.ShapeDtypeStruct((BC * H, W), heatmap.dtype),
        grid=(n_blocks,),
        in_specs=[pl.BlockSpec((R, W), lambda i: (i, 0))],
        out_specs=pl.BlockSpec((R, W), lambda i: (i, 0)),
        compiler_params=pltpu.CompilerParams(
            dimension_semantics=("parallel",),
            # explicit limit: v5e's scoped default is only 16 MiB
            vmem_limit_bytes=32 * 1024 * 1024),
    )(x)
    return out.reshape(B, C, H, W)
    # TODO(synk): for W far below 128 lane-density of kernel 1 is low; folding
    # several maps side-by-side along lanes would need an HBM transpose, so it
    # is intentionally left as-is (tolerable for CenterFace-sized maps).


# ----------------------------------------------------------------------------
# Kernel 2: per-batch decode of top-k detections
# ----------------------------------------------------------------------------
_MAX_HW_TILE = 8192     # keeps live VMEM ~<=10 MiB/chunk -> safe on v7x (64 MiB)


def _pick_hw_tile(HW):
    """Return (tile, nchunks, ragged).  Prefer the whole HW in one chunk, else a
    lane-dense 128-multiple divisor, else a ragged tail handled in-kernel."""
    if HW <= _MAX_HW_TILE:
        return HW, 1, False
    for t in range(_MAX_HW_TILE, 127, -128):
        if HW % t == 0:
            return t, HW // t, False
    t = _MAX_HW_TILE
    return t, pl.cdiv(HW, t), True


def _bf16_planes(x):
    """Split f32 -> three bf16-representable planes (returned in f32)."""
    p0 = x.astype(jnp.bfloat16).astype(jnp.float32)
    r1 = x - p0
    p1 = r1.astype(jnp.bfloat16).astype(jnp.float32)
    p2 = r1 - p1
    return p0, p1, p2


def _decode_kernel(sc_ref, idx_ref, off_ref, wh_ref, lm_ref, out_ref, g_ref, *,
                   W, HW, tile, ragged, thresh, scale):
    c = pl.program_id(1)

    @pl.when(c == 0)
    def _init():
        g_ref[...] = jnp.zeros_like(g_ref)

    # ---- chunked one-hot gather on the MXU ----------------------------------
    idx = idx_ref[0]                                  # (1, Kpad) int32
    tind = idx % HW                                   # spatial index y*W + x
    kpad = idx.shape[-1]

    # chunk-invariant iota; the per-chunk shift lands on the tiny (1, Kpad) row.
    lane_pos = jax.lax.broadcasted_iota(jnp.int32, (tile, kpad), 0)
    onehot = (lane_pos == (tind - c * tile)).astype(jnp.bfloat16)   # exact 0/1

    def load_group(ref):
        v = ref[0]                                    # (ch, tile) f32
        if ragged:
            # zero unspecified tail columns so garbage (possibly NaN) cannot
            # poison the 0 * x products of the one-hot matmul.
            colg = jax.lax.broadcasted_iota(jnp.int32, v.shape, 1) + c * tile
            v = jnp.where(colg < HW, v, 0.0)
        return _bf16_planes(v)

    o0, o1, o2 = load_group(off_ref)
    w0, w1, w2 = load_group(wh_ref)
    l0, l1, l2 = load_group(lm_ref)

    # One stacked (3F, tile) bf16 LHS -> a single MXU weight push per chunk;
    # three bf16 planes make the f32 gather exact to ~1 ulp.
    fs = jnp.concatenate([o0, w0, l0, o1, w1, l1, o2, w2, l2],
                         axis=0).astype(jnp.bfloat16)               # (3F, tile)
    g3 = jnp.dot(fs, onehot, preferred_element_type=jnp.float32)    # (3F, Kpad)
    F = g_ref.shape[0]
    g_ref[...] += g3[0:F] + g3[F:2 * F] + g3[2 * F:3 * F]

    # ---- finalize: decode, mask, scale; one lane-dense (n_out, Kpad) store ---
    @pl.when(c == pl.num_programs(1) - 1)
    def _finalize():
        scores = sc_ref[0]                            # (1, Kpad) f32
        idx_f = idx_ref[0]
        tind_f = idx_f % HW
        ids = (idx_f // HW).astype(jnp.float32)
        tys = (tind_f // W).astype(jnp.float32)
        txs = (tind_f % W).astype(jnp.float32)

        g = g_ref[...]                                # (F, Kpad): offx,offy,w,h,lms
        cx = txs + g[0:1, :]
        cy = tys + g[1:2, :]
        half_w = g[2:3, :] * 0.5
        half_h = g[3:4, :] * 0.5

        mask = scores > thresh
        neg = jnp.full_like(scores, -1.0)
        sel = lambda v: jnp.where(mask, v, neg)

        rows = [sel(ids), sel(scores),
                sel(cx - half_w) * scale, sel(cy - half_h) * scale,
                sel(cx + half_w) * scale, sel(cy + half_h) * scale]
        for j in range((F - 4) // 2):
            rows.append(sel(g[4 + 2 * j:5 + 2 * j, :] + cx) * scale)
            rows.append(sel(g[5 + 2 * j:6 + 2 * j, :] + cy) * scale)
        out_ref[0] = jnp.concatenate(rows, axis=0)    # (n_out, Kpad), lane-dense


# ----------------------------------------------------------------------------
# Wrapper reproducing Prediction.forward (nms=False)
# ----------------------------------------------------------------------------
def prediction_forward(heatmap, offset, wh, landmark, *,
                       topk=100, scale=4.0, except_class_thresh=0.01):
    # TODO(synk): the optional class-wise sequential NMS branch (nms=True) uses a
    # data-dependent Python while-loop; module default is nms=False, so omitted.
    B, C, H, W = heatmap.shape
    HW = H * W
    K = min(topk, C * HW)
    Kpad = ((K + 127) // 128) * 128

    # 1) peak suppression (Pallas)
    hm = heatmap_peak_nms(heatmap)

    # 2) top-k (XLA glue, same semantics as torch.topk sorted/largest)
    scores, indices = jax.lax.top_k(hm.reshape(B, C * HW), K)
    scores = jnp.pad(scores.astype(jnp.float32), ((0, 0), (0, Kpad - K)),
                     constant_values=-1.0)[:, None, :]          # (B, 1, Kpad)
    indices = jnp.pad(indices.astype(jnp.int32), ((0, 0), (0, Kpad - K)),
                      constant_values=0)[:, None, :]            # (B, 1, Kpad)

    # 3) channel-first feature views: pure reshapes of NCHW, no concat, no pad
    off = offset.astype(jnp.float32).reshape(B, offset.shape[1], HW)    # (B,2,HW)
    whr = wh.astype(jnp.float32).reshape(B, wh.shape[1], HW)            # (B,2,HW)
    lmr = landmark.astype(jnp.float32).reshape(B, landmark.shape[1], HW)  # (B,10,HW)
    nlm = lmr.shape[1]
    F = 4 + nlm
    n_out = 6 + nlm

    tile, nchunks, ragged = _pick_hw_tile(HW)

    kernel = functools.partial(_decode_kernel, W=W, HW=HW, tile=tile,
                               ragged=ragged,
                               thresh=float(except_class_thresh),
                               scale=float(scale))
    # TODO(synk): when B == 1 on a 2-TensorCore chip (v7x) the only parallel
    # axis has a single iteration; splitting Kpad/chunks into two parallel
    # halves would use both cores but is omitted here for simplicity.
    out = pl.pallas_call(
        kernel,
        out_shape=jax.ShapeDtypeStruct((B, n_out, Kpad), jnp.float32),
        grid=(B, nchunks),
        in_specs=[
            pl.BlockSpec((1, 1, Kpad), lambda b, c: (b, 0, 0)),
            pl.BlockSpec((1, 1, Kpad), lambda b, c: (b, 0, 0)),
            pl.BlockSpec((1, 2, tile), lambda b, c: (b, 0, c)),
            pl.BlockSpec((1, 2, tile), lambda b, c: (b, 0, c)),
            pl.BlockSpec((1, nlm, tile), lambda b, c: (b, 0, c)),
        ],
        out_specs=pl.BlockSpec((1, n_out, Kpad), lambda b, c: (b, 0, 0)),
        scratch_shapes=[pltpu.VMEM((F, Kpad), jnp.float32)],
        compiler_params=pltpu.CompilerParams(
            dimension_semantics=("parallel", "arbitrary"),
            vmem_limit_bytes=32 * 1024 * 1024),
    )(scores, indices, off, whr, lmr)

    # 4) slice the lane-dense slab back into the module's output layout (tiny ops)
    ids = jnp.transpose(out[:, 0:1, :K], (0, 2, 1))       # (B, K, 1)
    sc = jnp.transpose(out[:, 1:2, :K], (0, 2, 1))        # (B, K, 1)
    boxes = jnp.transpose(out[:, 2:6, :K], (0, 2, 1))     # (B, K, 4)
    lmarks = jnp.transpose(out[:, 6:6 + nlm, :K], (0, 2, 1))   # (B, K, 10)
    return ids, sc, boxes, lmarks


# ----------------------------------------------------------------------------
# Pure-JAX reference (mirrors the PyTorch forward) for verification
# ----------------------------------------------------------------------------
def prediction_reference(heatmap, offset, wh, landmark, *, topk, scale, thresh):
    B, C, H, W = heatmap.shape
    HW = H * W
    K = min(topk, C * HW)
    pooled = jax.lax.reduce_window(heatmap, -jnp.inf, jax.lax.max,
                                   (1, 1, 3, 3), (1, 1, 1, 1),
                                   [(0, 0), (0, 0), (1, 1), (1, 1)])
    hm = jnp.where(pooled == heatmap, heatmap, 0.0)
    flat = hm.reshape(B, C * HW)
    scores, indices = jax.lax.top_k(flat, K)
    scores = scores[:, :, None]
    ids = (indices // HW).astype(jnp.float32)[:, :, None]
    tind = indices % HW
    tys = (tind // W).astype(jnp.float32)
    txs = (tind % W).astype(jnp.float32)
    off = jnp.transpose(offset, (0, 2, 3, 1)).reshape(B, HW, 2)
    whr = jnp.transpose(wh, (0, 2, 3, 1)).reshape(B, HW, 2)
    lmr = jnp.transpose(landmark, (0, 2, 3, 1)).reshape(B, HW, 10)
    bidx = jnp.arange(B)[:, None]
    cx = txs + off[bidx, tind, 0]
    cy = tys + off[bidx, tind, 1]
    w = whr[bidx, tind, 0]
    h = whr[bidx, tind, 1]
    xmin, ymin = cx - w / 2, cy - h / 2
    xmax, ymax = cx + w / 2, cy + h / 2
    mask = scores > thresh
    neg = -jnp.ones_like(scores)
    ids_o = jnp.where(mask, ids, neg)
    sc_o = jnp.where(mask, scores, neg)
    box = jnp.concatenate([jnp.where(mask, v[:, :, None], neg)
                           for v in (xmin, ymin, xmax, ymax)], axis=-1)
    lms = []
    for j in range(5):
        lx = lmr[bidx, tind, 2 * j] + cx
        ly = lmr[bidx, tind, 2 * j + 1] + cy
        lms.append(jnp.where(mask, lx[:, :, None], neg))
        lms.append(jnp.where(mask, ly[:, :, None], neg))
    lmk = jnp.concatenate(lms, axis=-1)
    return ids_o, sc_o, box * scale, lmk * scale


if __name__ == "__main__":
    key = jax.random.PRNGKey(0)
    B, C, H, W = 2, 2, 16, 16
    TOPK = 8
    SCALE = 4.0
    THRESH = 0.01

    k1, k2, k3, k4 = jax.random.split(key, 4)
    heatmap = jax.random.uniform(k1, (B, C, H, W), jnp.float32)         # "sigmoid-like" scores
    offset = jax.random.uniform(k2, (B, 2, H, W), jnp.float32) - 0.5
    wh = jax.random.uniform(k3, (B, 2, H, W), jnp.float32) * 8.0
    landmark = jax.random.uniform(k4, (B, 10, H, W), jnp.float32) * 4.0 - 2.0

    ids, scores, bboxes, landmarks = prediction_forward(
        heatmap, offset, wh, landmark,
        topk=TOPK, scale=SCALE, except_class_thresh=THRESH)
    jax.block_until_ready((ids, scores, bboxes, landmarks))

    r_ids, r_sc, r_box, r_lmk = prediction_reference(
        heatmap, offset, wh, landmark, topk=TOPK, scale=SCALE, thresh=THRESH)

    np.testing.assert_allclose(np.asarray(ids), np.asarray(r_ids), rtol=1e-4, atol=1e-4)
    np.testing.assert_allclose(np.asarray(scores), np.asarray(r_sc), rtol=1e-4, atol=1e-4)
    np.testing.assert_allclose(np.asarray(bboxes), np.asarray(r_box), rtol=1e-4, atol=1e-4)
    np.testing.assert_allclose(np.asarray(landmarks), np.asarray(r_lmk), rtol=1e-4, atol=1e-4)

    assert ids.shape == (B, TOPK, 1) and scores.shape == (B, TOPK, 1)
    assert bboxes.shape == (B, TOPK, 4) and landmarks.shape == (B, TOPK, 10)
    print("KERNEL_OK")
</pallas_src>

<mosaic_0001>
module attributes {stable_mosaic.version = 11 : i64} {
  func.func @_peak_kernel(%arg0: i32, %arg1: memref<64x16xf32, #tpu.memory_space<vmem>>, %arg2: memref<64x16xf32, #tpu.memory_space<vmem>>) attributes {dimension_semantics = [#tpu.dimension_semantics<parallel>], iteration_bounds = array<i64: 1>, scalar_prefetch = 0 : i64, scratch_operands = 0 : i64, tpu.core_type = #tpu.core_type<tc>, window_params = [{transform_indices = @transform_0, window_bounds = array<i64: 64, 16>}, {transform_indices = @transform_1, window_bounds = array<i64: 64, 16>}]} {
    %c0 = arith.constant 0 : index
    %c0_0 = arith.constant 0 : index
    %0 = vector.load %arg1[%c0, %c0_0] : memref<64x16xf32, #tpu.memory_space<vmem>>, vector<64x16xf32>
    %1 = tpu.iota {dimensions = array<i32: 1>} : vector<64x16xi32>
    %c0_i32 = arith.constant 0 : i32
    %2 = vector.broadcast %c0_i32 : i32 to vector<64x16xi32>
    %3 = arith.cmpi eq, %1, %2 : vector<64x16xi32>
    %c1_i32 = arith.constant 1 : i32
    %4 = tpu.dynamic_rotate %0 by %c1_i32 dim 1 : vector<64x16xf32>, i32 -> vector<64x16xf32>
    %cst = arith.constant 0xFF800000 : f32
    %5 = vector.broadcast %cst : f32 to vector<64x16xf32>
    %6 = arith.select %3, %5, %4 : vector<64x16xi1>, vector<64x16xf32>
    %c15_i32 = arith.constant 15 : i32
    %7 = vector.broadcast %c15_i32 : i32 to vector<64x16xi32>
    %8 = arith.cmpi eq, %1, %7 : vector<64x16xi32>
    %c15_i32_1 = arith.constant 15 : i32
    %9 = tpu.dynamic_rotate %0 by %c15_i32_1 dim 1 : vector<64x16xf32>, i32 -> vector<64x16xf32>
    %cst_2 = arith.constant 0xFF800000 : f32
    %10 = vector.broadcast %cst_2 : f32 to vector<64x16xf32>
    %11 = arith.select %8, %10, %9 : vector<64x16xi1>, vector<64x16xf32>
    %12 = arith.maximumf %6, %11 : vector<64x16xf32>
    %13 = arith.maximumf %0, %12 : vector<64x16xf32>
    %14 = tpu.iota {dimensions = array<i32: 0>} : vector<64x16xi32>
    %c16_i32 = arith.constant 16 : i32
    %c0_i32_3 = arith.constant 0 : i32
    %15 = arith.cmpi eq, %c16_i32, %c0_i32_3 : i32
    %c1_i32_4 = arith.constant 1 : i32
    %16 = arith.select %15, %c1_i32_4, %c16_i32 : i32
    %17 = vector.broadcast %16 : i32 to vector<64x16xi32>
    %18 = arith.remsi %14, %17 : vector<64x16xi32>
    %c0_i32_5 = arith.constant 0 : i32
    %19 = vector.broadcast %c0_i32_5 : i32 to vector<64x16xi32>
    %20 = arith.cmpi ne, %18, %19 : vector<64x16xi32>
    %c0_i32_6 = arith.constant 0 : i32
    %21 = vector.broadcast %c0_i32_6 : i32 to vector<64x16xi32>
    %22 = arith.cmpi slt, %18, %21 : vector<64x16xi32>
    %c0_i32_7 = arith.constant 0 : i32
    %23 = arith.cmpi slt, %16, %c0_i32_7 : i32
    %24 = vector.broadcast %23 : i1 to vector<64x16xi1>
    %25 = vector.broadcast %24 : vector<64x16xi1> to vector<64x16xi1>
    %26 = arith.xori %22, %25 : vector<64x16xi1>
    %27 = arith.andi %26, %20 : vector<64x16xi1>
    %28 = vector.broadcast %16 : i32 to vector<64x16xi32>
    %29 = arith.addi %18, %28 : vector<64x16xi32>
    %30 = arith.select %27, %29, %18 : vector<64x16xi1>, vector<64x16xi32>
    %c0_i32_8 = arith.constant 0 : i32
    %31 = vector.broadcast %c0_i32_8 : i32 to vector<64x16xi32>
    %32 = arith.cmpi eq, %30, %31 : vector<64x16xi32>
    %c1_i32_9 = arith.constant 1 : i32
    %33 = tpu.dynamic_rotate %13 by %c1_i32_9 dim 0 : vector<64x16xf32>, i32 -> vector<64x16xf32>
    %cst_10 = arith.constant 0xFF800000 : f32
    %34 = vector.broadcast %cst_10 : f32 to vector<64x16xf32>
    %35 = arith.select %32, %34, %33 : vector<64x16xi1>, vector<64x16xf32>
    %c15_i32_11 = arith.constant 15 : i32
    %36 = vector.broadcast %c15_i32_11 : i32 to vector<64x16xi32>
    %37 = arith.cmpi eq, %30, %36 : vector<64x16xi32>
    %c63_i32 = arith.constant 63 : i32
    %38 = tpu.dynamic_rotate %13 by %c63_i32 dim 0 : vector<64x16xf32>, i32 -> vector<64x16xf32>
    %cst_12 = arith.constant 0xFF800000 : f32
    %39 = vector.broadcast %cst_12 : f32 to vector<64x16xf32>
    %40 = arith.select %37, %39, %38 : vector<64x16xi1>, vector<64x16xf32>
    %41 = arith.maximumf %35, %40 : vector<64x16xf32>
    %42 = arith.maximumf %13, %41 : vector<64x16xf32>
    %43 = arith.cmpf oeq, %42, %0 : vector<64x16xf32>
    %cst_13 = arith.constant 0.000000e+00 : f32
    %44 = vector.broadcast %cst_13 : f32 to vector<64x16xf32>
    %45 = arith.select %43, %0, %44 : vector<64x16xi1>, vector<64x16xf32>
    %c0_14 = arith.constant 0 : index
    %c0_15 = arith.constant 0 : index
    %46 = vector.load %arg2[%c0_14, %c0_15] : memref<64x16xf32, #tpu.memory_space<vmem>>, vector<64x16xf32>
    tpu.vector_store %arg2[%c0_14, %c0_15], %45 {strides = array<i32>} : memref<64x16xf32, #tpu.memory_space<vmem>>, vector<64x16xf32>,
    return
  }
  func.func @transform_0(%arg0: i32) -> (i32, i32) {
    %c0_i32 = arith.constant 0 : i32
    %c0_i32_0 = arith.constant 0 : i32
    return %arg0, %c0_i32 : i32, i32
  }
  func.func @transform_1(%arg0: i32) -> (i32, i32) {
    %c0_i32 = arith.constant 0 : i32
    %c0_i32_0 = arith.constant 0 : i32
    return %arg0, %c0_i32 : i32, i32
  }
}

</mosaic_0001>

<bundles_post_ra>
// kernel: tpu_custom_call.1
= control target key start
LH: loop header
LB: loop body
LE: loop exit
PB: predicated region body
PF: predicated region fallthrough
CT: control target
= control target key end

     0   :  { %s376_s10 = smov 16   ;;  %vm19_vm0 = vcmask 1047680   ;;  %s378_s23 = smov 127   ;;  %v16_v43 = vlaneseq  ;;  %vm360_vm7 = vcmask 130048   ;;  %s703_s0 = inlined_call_operand.vmem [shape: f32[64,16], index: 0, kind: input, shape index: {}]   ;;  %s704_s1 = inlined_call_operand.vmem [shape: f32[64,16], index: 1, kind: output, shape index: {}]  }
   0x1   :  { %v392_v0 = vld [vmem:[%s703_s0] sm:$0xff]  ;;  %v397_v1 = vld [vmem:[%s703_s0 + $0x10] sm:$0xff]  ;;  %v406_v2 = vld [vmem:[%s703_s0 + $0x8] sm:$0xff] }
   0x2   :  { %20 = vrot.lane.b32.xlu0 %v392_v0, %s376_s10  ;;  %26 = vrot.lane.b32.xlu1 %v397_v1, %s376_s10  ;;  %v411_v3 = vld [vmem:[%s703_s0 + $0x18] sm:$0xff]  ;;  %v420_v4 = vld [vmem:[%s703_s0 + $0x20] sm:$0xff]  ;;  %v485_v46 = vand.u32 127, %v16_v43  ;;  %v487_v47 = vshrl.u32 %v16_v43, 7 }
   0x3   :  { %v425_v5 = vld [vmem:[%s703_s0 + $0x28] sm:$0xff]  ;;  %v434_v6 = vld [vmem:[%s703_s0 + $0x30] sm:$0xff]  ;;  %v439_v7 = vld [vmem:[%s703_s0 + $0x38] sm:$0xff]  ;;  %s377_s0 = smov 113  }
   0x4   :  { %vm18_vm1 = vcmp.eq.s32.totalorder %v485_v46, 0  ;;  %vm108_vm2 = vcmp.eq.s32.totalorder %v485_v46, 15  ;;  %v160_v50 = vadd.s32 16, %v487_v47  ;;  %v159_v51 = vadd.s32 8, %v487_v47 }
   0x5   :  { %v161_v59 = vadd.s32 24, %v487_v47  ;;  %v162_v60 = vadd.s32 32, %v487_v47  ;;  %vm278_vm3 = vcmp.lt.s32.totalorder %v487_v47, 1  ;;  %vm311_vm4 = vcmp.lt.s32.totalorder %v487_v47, 7 }
   0x6   :  { %23 = vrot.lane.b32.xlu0 %v406_v2, %s376_s10  ;;  %29 = vrot.lane.b32.xlu1 %v411_v3, %s376_s10  ;;  %v184_v57 = vand.u32 15, %v160_v50  ;;  %v177_v58 = vand.u32 15, %v159_v51 }
   0x8   :  { %vm515_vm5 = vcmp.eq.s32.totalorder %v184_v57, 0  ;;  %vm519_vm6 = vcmp.eq.s32.totalorder %v177_v58, 15 }
   0xa   :  { %32 = vrot.lane.b32.xlu0 %v420_v4, %s376_s10  ;;  %35 = vrot.lane.b32.xlu1 %v425_v5, %s376_s10 }
   0xe   :  { %38 = vrot.lane.b32.xlu0 %v434_v6, %s376_s10  ;;  %41 = vrot.lane.b32.xlu1 %v439_v7, %s376_s10 }
  0x74   :  { %v21_v8 = vpop.permute.xlu0 %20  ;;  %v27_v9 = vpop.permute.xlu1 %26 }
  0x75   :  { %v22_v10 = vsel %vm19_vm0, %v21_v8, %v392_v0  ;;  %v28_v11 = vsel %vm19_vm0, %v27_v9, %v397_v1  ;;  %v163_v8 = vadd.s32 40, %v487_v47 }
  0x76   :  { %44 = vrot.lane.b32.xlu0 %v22_v10, %s376_s10 }
  0x78   :  { %v24_v12 = vpop.permute.xlu0 %23  ;;  %v30_v13 = vpop.permute.xlu1 %29 }
  0x79   :  { %v25_v14 = vsel %vm19_vm0, %v24_v12, %v406_v2  ;;  %v31_v15 = vsel %vm19_vm0, %v30_v13, %v411_v3 }
  0x7a   :  { %48 = vrot.lane.b32.xlu0 %v28_v11, %s376_s10  ;;  %46 = vrot.lane.b32.xlu1 %v25_v14, %s376_s10 }
  0x7c   :  { %v33_v16 = vpop.permute.xlu0 %32  ;;  %v36_v17 = vpop.permute.xlu1 %35 }
  0x7d   :  { %v34_v18 = vsel %vm19_vm0, %v33_v16, %v420_v4  ;;  %v37_v19 = vsel %vm19_vm0, %v36_v17, %v425_v5  ;;  %v191_v17 = vand.u32 15, %v161_v59 }
  0x7e   :  { %50 = vrot.lane.b32.xlu1 %v31_v15, %s376_s10  ;;  %52 = vrot.lane.b32.xlu0 %v34_v18, %s376_s10  ;;  %v198_v18 = vand.u32 15, %v162_v60 }
  0x7f   :  { %vm549_vm9 = vcmp.eq.s32.totalorder %v191_v17, 15 }
  0x80   :  { %v39_v20 = vpop.permute.xlu0 %38  ;;  %v42_v21 = vpop.permute.xlu1 %41  ;;  %vm545_vm8 = vcmp.eq.s32.totalorder %v198_v18, 0 }
  0x81   :  { %v40_v22 = vsel %vm19_vm0, %v39_v20, %v434_v6  ;;  %v43_v23 = vsel %vm19_vm0, %v42_v21, %v439_v7 }
  0x82   :  { %54 = vrot.lane.b32.xlu1 %v37_v19, %s376_s10  ;;  %56 = vrot.lane.b32.xlu0 %v40_v22, %s376_s10  ;;  %v524_v19 = vadd.s32 48, %v487_v47 }
  0x86   :  { %58 = vrot.lane.b32.xlu1 %v43_v23, %s376_s10 }
  0xe8   :  { %v45_v24 = vpop.permute.xlu0 %44 }
  0xe9   :  { %v60_v25 = vsel %vm19_vm0, %v45_v24, %v392_v0 }
  0xea   :  { %76 = vrot.lane.b32.xlu0 %v60_v25, %s377_s0 }
  0xec   :  { %v47_v26 = vpop.permute.xlu1 %46  ;;  %v49_v27 = vpop.permute.xlu0 %48 }
  0xed   :  { %v61_v28 = vsel %vm19_vm0, %v47_v26, %v406_v2  ;;  %v62_v29 = vsel %vm19_vm0, %v49_v27, %v397_v1 }
  0xee   :  { %78 = vrot.lane.b32.xlu1 %v61_v28, %s377_s0  ;;  %80 = vrot.lane.b32.xlu0 %v62_v29, %s377_s0 }
  0xf0   :  { %v51_v30 = vpop.permute.xlu1 %50  ;;  %v53_v31 = vpop.permute.xlu0 %52 }
  0xf1   :  { %v63_v32 = vsel %vm19_vm0, %v51_v30, %v411_v3  ;;  %v64_v33 = vsel %vm19_vm0, %v53_v31, %v420_v4 }
  0xf2   :  { %82 = vrot.lane.b32.xlu1 %v63_v32, %s377_s0  ;;  %84 = vrot.lane.b32.xlu0 %v64_v33, %s377_s0 }
  0xf4   :  { %v55_v34 = vpop.permute.xlu1 %54  ;;  %v57_v35 = vpop.permute.xlu0 %56 }
  0xf5   :  { %v65_v36 = vsel %vm19_vm0, %v55_v34, %v425_v5  ;;  %v66_v37 = vsel %vm19_vm0, %v57_v35, %v434_v6 }
  0xf6   :  { %86 = vrot.lane.b32.xlu1 %v65_v36, %s377_s0  ;;  %88 = vrot.lane.b32.xlu0 %v66_v37, %s377_s0 }
  0xf8   :  { %v59_v38 = vpop.permute.xlu1 %58 }
  0xf9   :  { %v67_v39 = vsel %vm19_vm0, %v59_v38, %v439_v7  ;;  %v212_v38 = vand.u32 15, %v524_v19 }
  0xfa   :  { %90 = vrot.lane.b32.xlu1 %v67_v39, %s377_s0  ;;  %109 = vrot.lane.b32.xlu0 %v60_v25, %s378_s23  ;;  %v205_v25 = vand.u32 15, %v163_v8  ;;  %v170_v8 = vand.u32 15, %v487_v47 }
  0xfb   :  { %vm633_vm14 = vcmp.eq.s32.totalorder %v212_v38, 0 }
  0xfc   :  { %vm577_vm10 = vcmp.eq.s32.totalorder %v205_v25, 15  ;;  %vm644_vm15 = vcmp.eq.s32.totalorder %v170_v8, 0 }
  0xfe   :  { %111 = vrot.lane.b32.xlu1 %v61_v28, %s378_s23  ;;  %113 = vrot.lane.b32.xlu0 %v62_v29, %s378_s23 }
 0x102   :  { %115 = vrot.lane.b32.xlu1 %v63_v32, %s378_s23  ;;  %117 = vrot.lane.b32.xlu0 %v64_v33, %s378_s23 }
 0x106   :  { %119 = vrot.lane.b32.xlu1 %v65_v36, %s378_s23  ;;  %121 = vrot.lane.b32.xlu0 %v66_v37, %s378_s23 }
 0x10a   :  { %123 = vrot.lane.b32.xlu1 %v67_v39, %s378_s23 }
 0x15c   :  { %v77_v40 = vpop.permute.xlu0 %76 }
 0x15d   :  { %v100_v54 = vsel %vm18_vm1, -inf, %v77_v40 }
 0x160   :  { %v79_v41 = vpop.permute.xlu1 %78  ;;  %v81_v42 = vpop.permute.xlu0 %80 }
 0x161   :  { %v101_v61 = vsel %vm18_vm1, -inf, %v79_v41  ;;  %v102_v9 = vsel %vm18_vm1, -inf, %v81_v42 }
 0x164   :  { %v83_v44 = vpop.permute.xlu1 %82  ;;  %v85_v45 = vpop.permute.xlu0 %84 }
 0x165   :  { %v103_v20 = vsel %vm18_vm1, -inf, %v83_v44  ;;  %v104_v26 = vsel %vm18_vm1, -inf, %v85_v45  ;;  %v165_v44 = vadd.s32 56, %v487_v47 }
 0x168   :  { %v87_v48 = vpop.permute.xlu1 %86  ;;  %v89_v49 = vpop.permute.xlu0 %88 }
 0x169   :  { %v105_v39 = vsel %vm18_vm1, -inf, %v87_v48  ;;  %v106_v45 = vsel %vm18_vm1, -inf, %v89_v49 }
 0x16c   :  { %v493_v52 = vpop.permute.xlu1 %90  ;;  %v110_v53 = vpop.permute.xlu0 %109 }
 0x16d   :  { %v133_v55 = vsel %vm108_vm2, -inf, %v110_v53 }
 0x16e   :  { %v141_v56 = vmax.f32 %v100_v54, %v133_v55 }
 0x170   :  { %v112_v62 = vpop.permute.xlu1 %111  ;;  %v114_v63 = vpop.permute.xlu0 %113  ;;  %v508_v10 = vmax.f32 %v392_v0, %v141_v56 }
 0x171   :  { %v134_v11 = vsel %vm108_vm2, -inf, %v112_v62  ;;  %v135_v12 = vsel %vm108_vm2, -inf, %v114_v63 }
 0x172   :  { %v142_v13 = vmax.f32 %v101_v61, %v134_v11  ;;  %v143_v15 = vmax.f32 %v102_v9, %v135_v12  ;;  %v270_v27 = vrot.slane %v508_v10, 7 }
 0x174   :  { %v529_v21 = vmax.f32 %v406_v2, %v142_v13  ;;  %v532_v22 = vmax.f32 %v397_v1, %v143_v15  ;;  %v116_v23 = vpop.permute.xlu1 %115  ;;  %v118_v24 = vpop.permute.xlu0 %117 }
 0x175   :  { %v136_v28 = vsel %vm108_vm2, -inf, %v116_v23  ;;  %v137_v29 = vsel %vm108_vm2, -inf, %v118_v24  ;;  %v107_v24 = vsel %vm18_vm1, -inf, %v493_v52 }
 0x176   :  { %v271_v30 = vrot.slane %v529_v21, 7  ;;  %v304_v31 = vrot.slane %v529_v21, 1  ;;  %v272_v32 = vrot.slane %v532_v22, 7  ;;  %v305_v33 = vrot.slane %v532_v22, 1 }
 0x177   :  { %v144_v34 = vmax.f32 %v103_v20, %v136_v28  ;;  %v145_v37 = vmax.f32 %v104_v26, %v137_v29  ;;  %v219_v26 = vand.u32 15, %v165_v44 }
 0x178   :  { %v285_v40 = vsel %vm278_vm3, %v270_v27, %v271_v30  ;;  %v317_v41 = vsel %vm311_vm4, %v304_v31, %v305_v33  ;;  %v120_v42 = vpop.permute.xlu1 %119  ;;  %v122_v43 = vpop.permute.xlu0 %121  ;;  %v284_v53 = vsel %vm278_vm3, %v271_v30, %v272_v32 }
 0x179   :  { %v321_v48 = vsel %vm519_vm6, -inf, %v317_v41  ;;  %v152_v50 = vmax.f32 %v411_v3, %v144_v34  ;;  %v571_v51 = vmax.f32 %v420_v4, %v145_v37  ;;  %v138_v55 = vsel %vm108_vm2, -inf, %v120_v42 }
 0x17a   :  { %v329_v54 = vmax.f32 %v285_v40, %v321_v48  ;;  %v139_v49 = vsel %vm108_vm2, -inf, %v122_v43  ;;  %v146_v62 = vmax.f32 %v105_v39, %v138_v55  ;;  %v289_v9 = vsel %vm515_vm5, -inf, %v284_v53 }
 0x17b   :  { %v273_v57 = vrot.slane %v152_v50, 7  ;;  %v306_v58 = vrot.slane %v152_v50, 1  ;;  %v274_v59 = vrot.slane %v571_v51, 7  ;;  %v307_v60 = vrot.slane %v571_v51, 1 }
 0x17c   :  { %v337_v61 = vmax.f32 %v529_v21, %v329_v54  ;;  %v147_v63 = vmax.f32 %v106_v45, %v139_v49  ;;  %v124_v15 = vpop.permute.xlu1 %123  ;;  %v154_v20 = vmax.f32 %v425_v5, %v146_v62  ;;  %v303_v42 = vrot.slane %v508_v10, 1 }
 0x17d   :  { %v283_v11 = vsel %vm278_vm3, %v272_v32, %v273_v57  ;;  %v316_v12 = vsel %vm311_vm4, %v305_v33, %v306_v58  ;;  %v315_v13 = vsel %vm311_vm4, %v306_v58, %v307_v60  ;;  %v282_v17 = vsel %vm278_vm3, %v273_v57, %v274_v59 }
 0x17e   :  { %vm345_vm11 = vcmp.eq.f32.partialorder %v337_v61, %v406_v2  ;;  %v330_v16 = vmax.f32 %v289_v9, %v316_v12  ;;  %v323_v14 = vsel %vm549_vm9, -inf, %v315_v13  ;;  %v155_v23 = vmax.f32 %v434_v6, %v147_v63 }
 0x17f   :  { %v353_v18 = vsel %vm345_vm11, %v406_v2, 0.0  ;;  %v331_v19 = vmax.f32 %v283_v11, %v323_v14  ;;  %v140_v2 = vsel %vm108_vm2, -inf, %v124_v15  ;;  %v275_v29 = vrot.slane %v154_v20, 7 }
 0x180   :  { %362 = vst.msk [vmem:[%s704_s1 + $0x8] sm:$0xff] %vm360_vm7, %v353_v18  ;;  %v338_v25 = vmax.f32 %v532_v22, %v330_v16  ;;  %v308_v30 = vrot.slane %v154_v20, 1  ;;  %v276_v32 = vrot.slane %v155_v23, 7  ;;  %v291_v52 = vsel %vm545_vm8, -inf, %v282_v17 }
 0x181   :  { %v339_v28 = vmax.f32 %v152_v50, %v331_v19  ;;  %v309_v33 = vrot.slane %v155_v23, 1  ;;  %v148_v34 = vmax.f32 %v107_v24, %v140_v2  ;;  %v281_v22 = vsel %vm278_vm3, %v274_v59, %v275_v29 }
 0x182   :  { %vm346_vm12 = vcmp.eq.f32.partialorder %v338_v25, %v397_v1  ;;  %v314_v46 = vsel %vm311_vm4, %v307_v60, %v308_v30  ;;  %v280_v40 = vsel %vm278_vm3, %v275_v29, %v276_v32  ;;  %vm648_vm0 = vcmp.eq.s32.totalorder %v219_v26, 15 }
 0x183   :  { %v354_v36 = vsel %vm346_vm12, %v397_v1, 0.0  ;;  %vm347_vm13 = vcmp.eq.f32.partialorder %v339_v28, %v411_v3  ;;  %v332_v37 = vmax.f32 %v291_v52, %v314_v46  ;;  %v313_v39 = vsel %vm311_vm4, %v308_v30, %v309_v33 }
 0x184   :  { %363 = vst.msk [vmem:[%s704_s1 + $0x10] sm:$0xff] %vm360_vm7, %v354_v36  ;;  %v355_v35 = vsel %vm347_vm13, %v411_v3, 0.0  ;;  %v325_v41 = vsel %vm577_vm10, -inf, %v313_v39  ;;  %v156_v3 = vmax.f32 %v439_v7, %v148_v34  ;;  %v318_v53 = vsel %vm311_vm4, %v303_v42, %v304_v31 }
 0x185   :  { %364 = vst.msk [vmem:[%s704_s1 + $0x18] sm:$0xff] %vm360_vm7, %v355_v35  ;;  %v340_v43 = vmax.f32 %v571_v51, %v332_v37  ;;  %v333_v44 = vmax.f32 %v281_v22, %v325_v41  ;;  %v293_v51 = vsel %vm633_vm14, -inf, %v280_v40 }
 0x186   :  { %v277_v48 = vrot.slane %v156_v3, 7  ;;  %v310_v50 = vrot.slane %v156_v3, 1 }
 0x187   :  { %vm348_vm1 = vcmp.eq.f32.partialorder %v340_v43, %v420_v4  ;;  %v341_v54 = vmax.f32 %v154_v20, %v333_v44 }
 0x188   :  { %v356_v55 = vsel %vm348_vm1, %v420_v4, 0.0  ;;  %v279_v56 = vsel %vm278_vm3, %v276_v32, %v277_v48  ;;  %v286_v49 = vsel %vm278_vm3, %v277_v48, %v270_v27  ;;  %v312_v21 = vsel %vm311_vm4, %v309_v33, %v310_v50 }
 0x189   :  { %365 = vst.msk [vmem:[%s704_s1 + $0x20] sm:$0xff] %vm360_vm7, %v356_v55  ;;  %vm349_vm2 = vcmp.eq.f32.partialorder %v341_v54, %v425_v5  ;;  %v287_v4 = vsel %vm644_vm15, -inf, %v286_v49  ;;  %v319_v31 = vsel %vm311_vm4, %v310_v50, %v303_v42  ;;  %v334_v57 = vmax.f32 %v293_v51, %v312_v21 }
 0x18a   :  { %v357_v58 = vsel %vm349_vm2, %v425_v5, 0.0  ;;  %v327_v27 = vsel %vm648_vm0, -inf, %v319_v31  ;;  %v328_v59 = vmax.f32 %v287_v4, %v318_v53 }
 0x18b   :  { %366 = vst.msk [vmem:[%s704_s1 + $0x28] sm:$0xff] %vm360_vm7, %v357_v58  ;;  %v335_v60 = vmax.f32 %v279_v56, %v327_v27  ;;  %v342_v61 = vmax.f32 %v155_v23, %v334_v57 }
 0x18c   :  { %v336_v62 = vmax.f32 %v508_v10, %v328_v59 }
 0x18d   :  { %v343_v63 = vmax.f32 %v156_v3, %v335_v60  ;;  %vm350_vm3 = vcmp.eq.f32.partialorder %v342_v61, %v434_v6 }
 0x18e   :  { %vm344_vm4 = vcmp.eq.f32.partialorder %v336_v62, %v392_v0  ;;  %v358_v5 = vsel %vm350_vm3, %v434_v6, 0.0 }
 0x18f   :  { %vm351_vm5 = vcmp.eq.f32.partialorder %v343_v63, %v439_v7  ;;  %v352_v47 = vsel %vm344_vm4, %v392_v0, 0.0  ;;  %367 = vst.msk [vmem:[%s704_s1 + $0x30] sm:$0xff] %vm360_vm7, %v358_v5 }
 0x190   :  { %v359_v8 = vsel %vm351_vm5, %v439_v7, 0.0  ;;  %361 = vst.msk [vmem:[%s704_s1] sm:$0xff] %vm360_vm7, %v352_v47 }
 0x191   :  { %368 = vst.msk [vmem:[%s704_s1 + $0x38] sm:$0xff] %vm360_vm7, %v359_v8 }

</bundles_post_ra>
